<compile_context>
chip_gen: v6e
topology: v6e:2x2x1
jax: 0.10.0
libtpu: 0.0.40
codegen_flags: <defaults>
</compile_context>

<pallas_src>
import functools

import jax
import jax.numpy as jnp
from jax import lax
from jax.experimental import pallas as pl
from jax.experimental.pallas import tpu as pltpu

# ---------------- configuration (small synthetic sizes) ----------------
NUM_HEADS = 16           # H
NUM_SPATIAL = 16         # spatial_pos_encoder vocab
NUM_EDGES = 16           # edge_encoder vocab
NUM_EDGE_DIS = 8         # edge_dis_encoder "distance" vocab
MULTI_HOP_MAX_DIST = 4   # D  (multi_hop_max_dist)
EDGE_FEAT = 3            # E  (edge feature dim of edge_input)
N_NODE = 7               # nodes per graph (without the global token)
N1 = N_NODE + 1          # +1 global token -> 8
BATCH = 2


# ---------------------------- Pallas kernel ----------------------------
def graph_attn_bias_kernel(scal_ref, ei_ref, w_sp_ref, w_ed_ref, t_ref,
                           out_ref, *, e_feat, sub_lanes):
    H, T = out_ref.shape
    S = w_sp_ref.shape[1]
    D, _, NE = w_ed_ref.shape
    E = e_feat
    SUB = sub_lanes

    # Weights / virtual-distance t: loaded once per grid step, stay in vregs.
    w_sp = w_sp_ref[...]                          # [H, S]
    w_ed = [w_ed_ref[d] for d in range(D)]        # D x [H, NE]
    t = t_ref[...]                                # [H, 1]

    # Statically-unrolled loop over register-resident SUB-lane sub-chunks.
    for c in range(T // SUB):
        lo, hi = c * SUB, (c + 1) * SUB
        sc = scal_ref[:, lo:hi]                   # [3, SUB] f32
        ab = sc[0:1, :]                           # attn_bias
        sp = sc[1:2, :].astype(jnp.int32)         # spatial_pos (exact in f32)
        inner = sc[2:3, :]                        # 1 inside [1:,1:] grid, else 0
        ei = ei_ref[:, lo:hi]                     # [D*E, SUB] i32

        # Spatial-pos one-hot -> one small MXU dot.
        iota_s = lax.broadcasted_iota(jnp.int32, (S, SUB), 0)
        onehot_s = (iota_s == sp).astype(jnp.float32)
        bias = jnp.dot(w_sp, onehot_s, preferred_element_type=jnp.float32)

        # Multi-hop normalisation 1/spatial_pos_ (EUP approx reciprocal).
        sp_ = jnp.where(sp == 0, 1, sp)
        sp_ = jnp.where(sp_ > 1, sp_ - 1, sp_)
        sp_ = jnp.clip(sp_, 0, D)
        inv_sp = pl.reciprocal(sp_.astype(jnp.float32), approx=True)  # [1,SUB]

        # Per-hop edge one-hot counts: i32 accumulate, one f32 convert + scale
        # per hop, then a per-hop [H,NE]@[NE,SUB] dot accumulated into bias
        # (no VMEM scratch, no store->reload round-trip).
        iota_e = lax.broadcasted_iota(jnp.int32, (NE, SUB), 0)
        for d in range(D):
            cnt = (iota_e == ei[d * E:d * E + 1, :]).astype(jnp.int32)
            for e in range(1, E):
                cnt = cnt + (iota_e == ei[d * E + e:d * E + e + 1, :])
            bias = bias + jnp.dot(w_ed[d], cnt.astype(jnp.float32) * inv_sp,
                                  preferred_element_type=jnp.float32)

        # out = 2*attn_bias + tmask*t + inner*bias   with tmask == 1 - inner
        out_ref[:, lo:hi] = 2.0 * ab + t + inner * (bias - t)


# ------------------------------ wrapper --------------------------------
@functools.partial(jax.jit, static_argnames=("multi_hop_max_dist",))
def graph_attn_bias(attn_bias, spatial_pos, edge_input,
                    spatial_w, edge_w, edge_dis_w, t_w,
                    multi_hop_max_dist):
    B, n_node = spatial_pos.shape[:2]
    n1 = n_node + 1
    pairs = n1 * n1
    H = spatial_w.shape[1]
    D = multi_hop_max_dist
    E = edge_input.shape[-1]
    S = spatial_w.shape[0]
    NE = edge_w.shape[0]

    BP = B * pairs                                   # flattened pair axis

    # --- lane tiling: large DMA tiles (fewer grid steps), >=MIN_STEPS grid
    #     steps when possible (v7x megacore), inner SUB-lane sub-chunks keep
    #     the one-hot build register-resident.
    SUB_LANES = 512
    MAX_TILE_CHUNKS = 32       # 4096 lanes per grid step max (32 f32 vregs)
    MIN_STEPS = 4              # keep the grid splittable across v7x's 2 TCs
    n_chunks = -(-BP // 128)
    tile_chunks = max(1, min(MAX_TILE_CHUNKS, -(-n_chunks // MIN_STEPS)))
    tile_chunks = min(tile_chunks, n_chunks)
    sub_chunks = SUB_LANES // 128
    if tile_chunks >= sub_chunks:
        tile_chunks = (tile_chunks // sub_chunks) * sub_chunks
        sub = SUB_LANES
    else:
        sub = 128 * tile_chunks
    lane_tile = 128 * tile_chunks
    BP_pad = -(-BP // lane_tile) * lane_tile
    pad = BP_pad - BP

    # --- packed scalar stream [3, BP]: attn_bias, spatial_pos, inner gate ---
    ab_flat = attn_bias.reshape(BP).astype(jnp.float32)
    sp_pad = jnp.pad(spatial_pos, ((0, 0), (1, 0), (1, 0)))     # global token
    sp_flat = sp_pad.reshape(BP).astype(jnp.float32)            # <16, exact f32
    pidx = jnp.arange(pairs)
    row = pidx // n1
    col = pidx % n1
    inner = ((row >= 1) & (col >= 1)).astype(jnp.float32)
    inner_flat = jnp.tile(inner, (B,))
    scal = jnp.stack([ab_flat, sp_flat, inner_flat], axis=0)    # [3, BP]

    # --- edge_input: slice hops, pad global token, (D*E) on sublanes ---
    ei = edge_input[:, :, :, :D, :]
    ei_pad = jnp.pad(ei, ((0, 0), (1, 0), (1, 0), (0, 0), (0, 0)))
    ei_flat = jnp.transpose(ei_pad, (3, 4, 0, 1, 2)).reshape(D * E, BP)
    ei_flat = ei_flat.astype(jnp.int32)

    if pad:
        scal = jnp.pad(scal, ((0, 0), (0, pad)))
        ei_flat = jnp.pad(ei_flat, ((0, 0), (0, pad)))

    # --- fused per-hop weights: W_d' = (edge_w @ edge_dis[d]) / E ---
    edge_dis = edge_dis_w.reshape(-1, H, H)[:D]                  # [D,H,H]
    wd = jnp.einsum('eh,dhk->dek', edge_w, edge_dis) / float(E)  # [D,NE,H]
    w_ed_t = jnp.transpose(wd, (0, 2, 1)).astype(jnp.float32)    # [D,H,NE]
    w_sp_t = jnp.transpose(spatial_w).astype(jnp.float32)        # [H,S]
    t_t = t_w.reshape(H, 1).astype(jnp.float32)                  # [H,1]

    kernel = functools.partial(graph_attn_bias_kernel,
                               e_feat=E, sub_lanes=sub)

    grid = (BP_pad // lane_tile,)
    out = pl.pallas_call(
        kernel,
        out_shape=jax.ShapeDtypeStruct((H, BP_pad), jnp.float32),
        grid=grid,
        in_specs=[
            pl.BlockSpec((3, lane_tile), lambda i: (0, i)),       # packed scalars
            pl.BlockSpec((D * E, lane_tile), lambda i: (0, i)),   # edge indices
            pl.BlockSpec((H, S), lambda i: (0, 0)),               # spatial W^T
            pl.BlockSpec((D, H, NE), lambda i: (0, 0, 0)),        # per-hop W'^T
            pl.BlockSpec((H, 1), lambda i: (0, 0)),               # t^T
        ],
        out_specs=pl.BlockSpec((H, lane_tile), lambda i: (0, i)),
        compiler_params=pltpu.CompilerParams(dimension_semantics=("parallel",)),
    )(scal, ei_flat, w_sp_t, w_ed_t, t_t)

    # Back to the PyTorch layout [B, H, n_node+1, n_node+1]. (The transpose is
    # fused under jit; a head-major consumer could take out[:, :BP] directly.)
    out = out[:, :BP].reshape(H, B, n1, n1)
    return jnp.transpose(out, (1, 0, 2, 3))


# ---------------------- pure-JAX reference (check) ----------------------
def reference(attn_bias, spatial_pos, edge_input,
              spatial_w, edge_w, edge_dis_w, t_w, D):
    B, n_node = spatial_pos.shape[:2]
    H = spatial_w.shape[1]
    gab = jnp.repeat(attn_bias[:, None], H, axis=1)                 # [B,H,n1,n1]
    spb = jnp.transpose(spatial_w[spatial_pos], (0, 3, 1, 2))       # [B,H,N,N]
    gab = gab.at[:, :, 1:, 1:].add(spb)
    t = t_w.reshape(1, H, 1)
    gab = gab.at[:, :, 1:, 0].add(t)
    gab = gab.at[:, :, 0, :].add(t)
    sp_ = jnp.where(spatial_pos == 0, 1, spatial_pos)
    sp_ = jnp.where(sp_ > 1, sp_ - 1, sp_)
    sp_ = jnp.clip(sp_, 0, D)
    ei = edge_input[:, :, :, :D, :]
    emb = edge_w[ei].mean(-2)                                       # [B,N,N,D,H]
    max_dist = emb.shape[-2]
    flat = jnp.transpose(emb, (3, 0, 1, 2, 4)).reshape(max_dist, -1, H)
    Wd = edge_dis_w.reshape(-1, H, H)[:max_dist]
    flat = jnp.einsum('dnh,dhk->dnk', flat, Wd)
    emb = jnp.transpose(flat.reshape(max_dist, B, n_node, n_node, H),
                        (1, 2, 3, 0, 4))
    eb = jnp.transpose(emb.sum(-2) / sp_[..., None].astype(jnp.float32),
                       (0, 3, 1, 2))
    gab = gab.at[:, :, 1:, 1:].add(eb)
    gab = gab + attn_bias[:, None]
    return gab


if __name__ == "__main__":
    key = jax.random.PRNGKey(0)
    ks = jax.random.split(key, 8)
    H = NUM_HEADS

    # deterministic parameter init (shapes from the module's __init__)
    edge_w = jax.random.normal(ks[0], (NUM_EDGES, H), jnp.float32) * 0.02
    edge_w = edge_w.at[0].set(0.0)          # padding_idx=0
    spatial_w = jax.random.normal(ks[1], (NUM_SPATIAL, H), jnp.float32) * 0.02
    spatial_w = spatial_w.at[0].set(0.0)    # padding_idx=0
    t_w = jax.random.normal(ks[2], (1, H), jnp.float32) * 0.02
    edge_dis_w = jax.random.normal(ks[3], (NUM_EDGE_DIS * H * H, 1),
                                   jnp.float32) * 0.02

    # synthetic batched_data
    attn_bias = jax.random.normal(ks[4], (BATCH, N1, N1), jnp.float32)
    spatial_pos = jax.random.randint(ks[5], (BATCH, N_NODE, N_NODE),
                                     0, NUM_SPATIAL)
    full_dist = MULTI_HOP_MAX_DIST + 1      # raw hop dim, sliced to D in forward
    edge_input = jax.random.randint(
        ks[6], (BATCH, N_NODE, N_NODE, full_dist, EDGE_FEAT), 0, NUM_EDGES)

    out = graph_attn_bias(attn_bias, spatial_pos, edge_input,
                          spatial_w, edge_w, edge_dis_w, t_w,
                          multi_hop_max_dist=MULTI_HOP_MAX_DIST)
    out = jax.block_until_ready(out)

    ref = reference(attn_bias, spatial_pos, edge_input,
                    spatial_w, edge_w, edge_dis_w, t_w, MULTI_HOP_MAX_DIST)

    assert out.shape == (BATCH, H, N1, N1), out.shape
    assert jnp.allclose(out, ref, rtol=1e-4, atol=1e-4), \
        float(jnp.max(jnp.abs(out - ref)))
    print("KERNEL_OK")
</pallas_src>

<mosaic_0001>
module attributes {stable_mosaic.version = 11 : i64} {
  func.func @graph_attn_bias_kernel(%arg0: i32, %arg1: memref<3x128xf32, #tpu.memory_space<vmem>>, %arg2: memref<12x128xi32, #tpu.memory_space<vmem>>, %arg3: memref<16x16xf32, #tpu.memory_space<vmem>>, %arg4: memref<4x16x16xf32, #tpu.memory_space<vmem>>, %arg5: memref<16x1xf32, #tpu.memory_space<vmem>>, %arg6: memref<16x128xf32, #tpu.memory_space<vmem>>) attributes {dimension_semantics = [#tpu.dimension_semantics<parallel>], iteration_bounds = array<i64: 1>, scalar_prefetch = 0 : i64, scratch_operands = 0 : i64, tpu.core_type = #tpu.core_type<tc>, window_params = [{transform_indices = @transform_0, window_bounds = array<i64: 3, 128>}, {transform_indices = @transform_1, window_bounds = array<i64: 12, 128>}, {pipeline_mode = #tpu.pipeline_mode<synchronous>, transform_indices = @transform_2, window_bounds = array<i64: 16, 16>}, {pipeline_mode = #tpu.pipeline_mode<synchronous>, transform_indices = @transform_3, window_bounds = array<i64: 4, 16, 16>}, {pipeline_mode = #tpu.pipeline_mode<synchronous>, transform_indices = @transform_4, window_bounds = array<i64: 16, 1>}, {transform_indices = @transform_5, window_bounds = array<i64: 16, 128>}]} {
    %c0 = arith.constant 0 : index
    %c0_0 = arith.constant 0 : index
    %0 = vector.load %arg3[%c0, %c0_0] : memref<16x16xf32, #tpu.memory_space<vmem>>, vector<16x16xf32>
    %c0_1 = arith.constant 0 : index
    %c0_2 = arith.constant 0 : index
    %c0_3 = arith.constant 0 : index
    %1 = vector.load %arg4[%c0_1, %c0_2, %c0_3] : memref<4x16x16xf32, #tpu.memory_space<vmem>>, vector<1x16x16xf32>
    %2 = vector.shape_cast %1 : vector<1x16x16xf32> to vector<16x16xf32>
    %c1 = arith.constant 1 : index
    %c0_4 = arith.constant 0 : index
    %c0_5 = arith.constant 0 : index
    %3 = vector.load %arg4[%c1, %c0_4, %c0_5] : memref<4x16x16xf32, #tpu.memory_space<vmem>>, vector<1x16x16xf32>
    %4 = vector.shape_cast %3 : vector<1x16x16xf32> to vector<16x16xf32>
    %c2 = arith.constant 2 : index
    %c0_6 = arith.constant 0 : index
    %c0_7 = arith.constant 0 : index
    %5 = vector.load %arg4[%c2, %c0_6, %c0_7] : memref<4x16x16xf32, #tpu.memory_space<vmem>>, vector<1x16x16xf32>
    %6 = vector.shape_cast %5 : vector<1x16x16xf32> to vector<16x16xf32>
    %c3 = arith.constant 3 : index
    %c0_8 = arith.constant 0 : index
    %c0_9 = arith.constant 0 : index
    %7 = vector.load %arg4[%c3, %c0_8, %c0_9] : memref<4x16x16xf32, #tpu.memory_space<vmem>>, vector<1x16x16xf32>
    %8 = vector.shape_cast %7 : vector<1x16x16xf32> to vector<16x16xf32>
    %c0_10 = arith.constant 0 : index
    %c0_11 = arith.constant 0 : index
    %9 = vector.load %arg5[%c0_10, %c0_11] : memref<16x1xf32, #tpu.memory_space<vmem>>, vector<16x1xf32>
    %c0_12 = arith.constant 0 : index
    %c0_13 = arith.constant 0 : index
    %10 = vector.load %arg1[%c0_12, %c0_13] : memref<3x128xf32, #tpu.memory_space<vmem>>, vector<3x128xf32>
    %11 = vector.extract_strided_slice %10 {offsets = [0, 0], sizes = [1, 128], strides = [1, 1]} : vector<3x128xf32> to vector<1x128xf32>
    %12 = vector.extract_strided_slice %10 {offsets = [1, 0], sizes = [1, 128], strides = [1, 1]} : vector<3x128xf32> to vector<1x128xf32>
    %13 = arith.fptosi %12 : vector<1x128xf32> to vector<1x128xi32>
    %14 = vector.extract_strided_slice %10 {offsets = [2, 0], sizes = [1, 128], strides = [1, 1]} : vector<3x128xf32> to vector<1x128xf32>
    %c0_14 = arith.constant 0 : index
    %c0_15 = arith.constant 0 : index
    %15 = vector.load %arg2[%c0_14, %c0_15] : memref<12x128xi32, #tpu.memory_space<vmem>>, vector<12x128xi32>
    %16 = tpu.iota {dimensions = array<i32: 0>} : vector<16x128xi32>
    %17 = vector.broadcast %13 : vector<1x128xi32> to vector<16x128xi32>
    %18 = arith.cmpi eq, %16, %17 : vector<16x128xi32>
    %19 = arith.extui %18 : vector<16x128xi1> to vector<16x128xi32>
    %20 = arith.sitofp %19 : vector<16x128xi32> to vector<16x128xf32>
    %cst = arith.constant dense<0.000000e+00> : vector<16x128xf32>
    %21 = tpu.matmul %0, %20, %cst {dimension_numbers = #tpu.dot_dimension_numbers<[1], [0], [0], [1], [0, 0, 1, 1], [], []>} : vector<16x16xf32>, vector<16x128xf32>, vector<16x128xf32> -> vector<16x128xf32>
    %c0_i32 = arith.constant 0 : i32
    %22 = vector.broadcast %c0_i32 : i32 to vector<1x128xi32>
    %23 = arith.cmpi eq, %13, %22 : vector<1x128xi32>
    %c1_i32 = arith.constant 1 : i32
    %24 = vector.broadcast %c1_i32 : i32 to vector<1x128xi32>
    %25 = arith.select %23, %24, %13 : vector<1x128xi1>, vector<1x128xi32>
    %c1_i32_16 = arith.constant 1 : i32
    %26 = vector.broadcast %c1_i32_16 : i32 to vector<1x128xi32>
    %27 = arith.cmpi sgt, %25, %26 : vector<1x128xi32>
    %c1_i32_17 = arith.constant 1 : i32
    %28 = vector.broadcast %c1_i32_17 : i32 to vector<1x128xi32>
    %29 = arith.subi %25, %28 : vector<1x128xi32>
    %30 = arith.select %27, %29, %25 : vector<1x128xi1>, vector<1x128xi32>
    %c0_i32_18 = arith.constant 0 : i32
    %c4_i32 = arith.constant 4 : i32
    %31 = vector.broadcast %c0_i32_18 : i32 to vector<1x128xi32>
    %32 = arith.maxsi %31, %30 : vector<1x128xi32>
    %33 = vector.broadcast %c4_i32 : i32 to vector<1x128xi32>
    %34 = arith.minsi %33, %32 : vector<1x128xi32>
    %35 = arith.sitofp %34 : vector<1x128xi32> to vector<1x128xf32>
    %36 = tpu.reciprocal %35 {approx = true} : vector<1x128xf32> -> vector<1x128xf32>
    %37 = tpu.iota {dimensions = array<i32: 0>} : vector<16x128xi32>
    %38 = vector.extract_strided_slice %15 {offsets = [0, 0], sizes = [1, 128], strides = [1, 1]} : vector<12x128xi32> to vector<1x128xi32>
    %39 = vector.broadcast %38 : vector<1x128xi32> to vector<16x128xi32>
    %40 = arith.cmpi eq, %37, %39 : vector<16x128xi32>
    %41 = arith.extui %40 : vector<16x128xi1> to vector<16x128xi32>
    %42 = vector.extract_strided_slice %15 {offsets = [1, 0], sizes = [1, 128], strides = [1, 1]} : vector<12x128xi32> to vector<1x128xi32>
    %43 = vector.broadcast %42 : vector<1x128xi32> to vector<16x128xi32>
    %44 = arith.cmpi eq, %37, %43 : vector<16x128xi32>
    %45 = arith.extui %44 : vector<16x128xi1> to vector<16x128xi32>
    %46 = arith.addi %41, %45 : vector<16x128xi32>
    %47 = vector.extract_strided_slice %15 {offsets = [2, 0], sizes = [1, 128], strides = [1, 1]} : vector<12x128xi32> to vector<1x128xi32>
    %48 = vector.broadcast %47 : vector<1x128xi32> to vector<16x128xi32>
    %49 = arith.cmpi eq, %37, %48 : vector<16x128xi32>
    %50 = arith.extui %49 : vector<16x128xi1> to vector<16x128xi32>
    %51 = arith.addi %46, %50 : vector<16x128xi32>
    %52 = arith.sitofp %51 : vector<16x128xi32> to vector<16x128xf32>
    %53 = vector.broadcast %36 : vector<1x128xf32> to vector<16x128xf32>
    %54 = arith.mulf %52, %53 : vector<16x128xf32>
    %cst_19 = arith.constant dense<0.000000e+00> : vector<16x128xf32>
    %55 = tpu.matmul %2, %54, %cst_19 {dimension_numbers = #tpu.dot_dimension_numbers<[1], [0], [0], [1], [0, 0, 1, 1], [], []>} : vector<16x16xf32>, vector<16x128xf32>, vector<16x128xf32> -> vector<16x128xf32>
    %56 = arith.addf %21, %55 : vector<16x128xf32>
    %57 = vector.extract_strided_slice %15 {offsets = [3, 0], sizes = [1, 128], strides = [1, 1]} : vector<12x128xi32> to vector<1x128xi32>
    %58 = vector.broadcast %57 : vector<1x128xi32> to vector<16x128xi32>
    %59 = arith.cmpi eq, %37, %58 : vector<16x128xi32>
    %60 = arith.extui %59 : vector<16x128xi1> to vector<16x128xi32>
    %61 = vector.extract_strided_slice %15 {offsets = [4, 0], sizes = [1, 128], strides = [1, 1]} : vector<12x128xi32> to vector<1x128xi32>
    %62 = vector.broadcast %61 : vector<1x128xi32> to vector<16x128xi32>
    %63 = arith.cmpi eq, %37, %62 : vector<16x128xi32>
    %64 = arith.extui %63 : vector<16x128xi1> to vector<16x128xi32>
    %65 = arith.addi %60, %64 : vector<16x128xi32>
    %66 = vector.extract_strided_slice %15 {offsets = [5, 0], sizes = [1, 128], strides = [1, 1]} : vector<12x128xi32> to vector<1x128xi32>
    %67 = vector.broadcast %66 : vector<1x128xi32> to vector<16x128xi32>
    %68 = arith.cmpi eq, %37, %67 : vector<16x128xi32>
    %69 = arith.extui %68 : vector<16x128xi1> to vector<16x128xi32>
    %70 = arith.addi %65, %69 : vector<16x128xi32>
    %71 = arith.sitofp %70 : vector<16x128xi32> to vector<16x128xf32>
    %72 = vector.broadcast %36 : vector<1x128xf32> to vector<16x128xf32>
    %73 = arith.mulf %71, %72 : vector<16x128xf32>
    %cst_20 = arith.constant dense<0.000000e+00> : vector<16x128xf32>
    %74 = tpu.matmul %4, %73, %cst_20 {dimension_numbers = #tpu.dot_dimension_numbers<[1], [0], [0], [1], [0, 0, 1, 1], [], []>} : vector<16x16xf32>, vector<16x128xf32>, vector<16x128xf32> -> vector<16x128xf32>
    %75 = arith.addf %56, %74 : vector<16x128xf32>
    %76 = vector.extract_strided_slice %15 {offsets = [6, 0], sizes = [1, 128], strides = [1, 1]} : vector<12x128xi32> to vector<1x128xi32>
    %77 = vector.broadcast %76 : vector<1x128xi32> to vector<16x128xi32>
    %78 = arith.cmpi eq, %37, %77 : vector<16x128xi32>
    %79 = arith.extui %78 : vector<16x128xi1> to vector<16x128xi32>
    %80 = vector.extract_strided_slice %15 {offsets = [7, 0], sizes = [1, 128], strides = [1, 1]} : vector<12x128xi32> to vector<1x128xi32>
    %81 = vector.broadcast %80 : vector<1x128xi32> to vector<16x128xi32>
    %82 = arith.cmpi eq, %37, %81 : vector<16x128xi32>
    %83 = arith.extui %82 : vector<16x128xi1> to vector<16x128xi32>
    %84 = arith.addi %79, %83 : vector<16x128xi32>
    %85 = vector.extract_strided_slice %15 {offsets = [8, 0], sizes = [1, 128], strides = [1, 1]} : vector<12x128xi32> to vector<1x128xi32>
    %86 = vector.broadcast %85 : vector<1x128xi32> to vector<16x128xi32>
    %87 = arith.cmpi eq, %37, %86 : vector<16x128xi32>
    %88 = arith.extui %87 : vector<16x128xi1> to vector<16x128xi32>
    %89 = arith.addi %84, %88 : vector<16x128xi32>
    %90 = arith.sitofp %89 : vector<16x128xi32> to vector<16x128xf32>
    %91 = vector.broadcast %36 : vector<1x128xf32> to vector<16x128xf32>
    %92 = arith.mulf %90, %91 : vector<16x128xf32>
    %cst_21 = arith.constant dense<0.000000e+00> : vector<16x128xf32>
    %93 = tpu.matmul %6, %92, %cst_21 {dimension_numbers = #tpu.dot_dimension_numbers<[1], [0], [0], [1], [0, 0, 1, 1], [], []>} : vector<16x16xf32>, vector<16x128xf32>, vector<16x128xf32> -> vector<16x128xf32>
    %94 = arith.addf %75, %93 : vector<16x128xf32>
    %95 = vector.extract_strided_slice %15 {offsets = [9, 0], sizes = [1, 128], strides = [1, 1]} : vector<12x128xi32> to vector<1x128xi32>
    %96 = vector.broadcast %95 : vector<1x128xi32> to vector<16x128xi32>
    %97 = arith.cmpi eq, %37, %96 : vector<16x128xi32>
    %98 = arith.extui %97 : vector<16x128xi1> to vector<16x128xi32>
    %99 = vector.extract_strided_slice %15 {offsets = [10, 0], sizes = [1, 128], strides = [1, 1]} : vector<12x128xi32> to vector<1x128xi32>
    %100 = vector.broadcast %99 : vector<1x128xi32> to vector<16x128xi32>
    %101 = arith.cmpi eq, %37, %100 : vector<16x128xi32>
    %102 = arith.extui %101 : vector<16x128xi1> to vector<16x128xi32>
    %103 = arith.addi %98, %102 : vector<16x128xi32>
    %104 = vector.extract_strided_slice %15 {offsets = [11, 0], sizes = [1, 128], strides = [1, 1]} : vector<12x128xi32> to vector<1x128xi32>
    %105 = vector.broadcast %104 : vector<1x128xi32> to vector<16x128xi32>
    %106 = arith.cmpi eq, %37, %105 : vector<16x128xi32>
    %107 = arith.extui %106 : vector<16x128xi1> to vector<16x128xi32>
    %108 = arith.addi %103, %107 : vector<16x128xi32>
    %109 = arith.sitofp %108 : vector<16x128xi32> to vector<16x128xf32>
    %110 = vector.broadcast %36 : vector<1x128xf32> to vector<16x128xf32>
    %111 = arith.mulf %109, %110 : vector<16x128xf32>
    %cst_22 = arith.constant dense<0.000000e+00> : vector<16x128xf32>
    %112 = tpu.matmul %8, %111, %cst_22 {dimension_numbers = #tpu.dot_dimension_numbers<[1], [0], [0], [1], [0, 0, 1, 1], [], []>} : vector<16x16xf32>, vector<16x128xf32>, vector<16x128xf32> -> vector<16x128xf32>
    %113 = arith.addf %94, %112 : vector<16x128xf32>
    %cst_23 = arith.constant 2.000000e+00 : f32
    %114 = vector.broadcast %cst_23 : f32 to vector<1x128xf32>
    %115 = arith.mulf %114, %11 : vector<1x128xf32>
    %116 = vector.broadcast %115 : vector<1x128xf32> to vector<16x128xf32>
    %117 = vector.broadcast %9 : vector<16x1xf32> to vector<16x128xf32>
    %118 = arith.addf %116, %117 : vector<16x128xf32>
    %119 = vector.broadcast %9 : vector<16x1xf32> to vector<16x128xf32>
    %120 = arith.subf %113, %119 : vector<16x128xf32>
    %121 = vector.broadcast %14 : vector<1x128xf32> to vector<16x128xf32>
    %122 = arith.mulf %121, %120 : vector<16x128xf32>
    %123 = arith.addf %118, %122 : vector<16x128xf32>
    %c0_24 = arith.constant 0 : index
    %c0_25 = arith.constant 0 : index
    %124 = vector.load %arg6[%c0_24, %c0_25] : memref<16x128xf32, #tpu.memory_space<vmem>>, vector<16x128xf32>
    tpu.vector_store %arg6[%c0_24, %c0_25], %123 {strides = array<i32>} : memref<16x128xf32, #tpu.memory_space<vmem>>, vector<16x128xf32>,
    return
  }
  func.func @transform_0(%arg0: i32) -> (i32, i32) {
    %c0_i32 = arith.constant 0 : i32
    %c0_i32_0 = arith.constant 0 : i32
    return %c0_i32, %arg0 : i32, i32
  }
  func.func @transform_1(%arg0: i32) -> (i32, i32) {
    %c0_i32 = arith.constant 0 : i32
    %c0_i32_0 = arith.constant 0 : i32
    return %c0_i32, %arg0 : i32, i32
  }
  func.func @transform_2(%arg0: i32) -> (i32, i32) {
    %c0_i32 = arith.constant 0 : i32
    %c0_i32_0 = arith.constant 0 : i32
    %c0_i32_1 = arith.constant 0 : i32
    return %c0_i32, %c0_i32_0 : i32, i32
  }
  func.func @transform_3(%arg0: i32) -> (i32, i32, i32) {
    %c0_i32 = arith.constant 0 : i32
    %c0_i32_0 = arith.constant 0 : i32
    %c0_i32_1 = arith.constant 0 : i32
    %c0_i32_2 = arith.constant 0 : i32
    return %c0_i32, %c0_i32_0, %c0_i32_1 : i32, i32, i32
  }
  func.func @transform_4(%arg0: i32) -> (i32, i32) {
    %c0_i32 = arith.constant 0 : i32
    %c0_i32_0 = arith.constant 0 : i32
    %c0_i32_1 = arith.constant 0 : i32
    return %c0_i32, %c0_i32_0 : i32, i32
  }
  func.func @transform_5(%arg0: i32) -> (i32, i32) {
    %c0_i32 = arith.constant 0 : i32
    %c0_i32_0 = arith.constant 0 : i32
    return %c0_i32, %arg0 : i32, i32
  }
}

</mosaic_0001>

<bundles_post_ra>
// kernel: tile.8
= control target key start
LH: loop header
LB: loop body
LE: loop exit
PB: predicated region body
PF: predicated region fallthrough
CT: control target
= control target key end

     0   :  { %s22_s0 = inlined_call_operand.vmem [shape: f32[64], index: 0, kind: input, shape index: {}]   ;;  %s23_s1 = inlined_call_operand.vmem [shape: f32[2,64], index: 1, kind: output, shape index: {}]  }
   0x1   :  { %v4_v0 = vld [vmem:[%s22_s0] ss:$0 sm:$0xff] }
   0x2   :  { %5 = vst [vmem:[%s23_s1] sm:$0x3] %v4_v0 }

// kernel: tile.9
= control target key start
LH: loop header
LB: loop body
LE: loop exit
PB: predicated region body
PF: predicated region fallthrough
CT: control target
= control target key end

     0   :  { %vm8_vm0 = vcmask 523264   ;;  %vm14_vm1 = vcmask 1048064   ;;  %s42_s0 = inlined_call_operand.vmem [shape: f32[2,64], index: 0, kind: input, shape index: {}]   ;;  %s43_s1 = inlined_call_operand.vmem [shape: f32[1,128], index: 1, kind: output, shape index: {}]  }
   0x1   :  { %v5_v0 = vld [vmem:[%s42_s0] sm:$0x3]  ;;  %s25_s0 = smov 64  }
   0x2   :  { %6 = vst [vmem:[#allocation1] sm:$0x3] %v5_v0 }
   0x9   :  { %v11_v1 = vld [vmem:[#allocation1 + $0x1] sm:$0x1]   ;;  %v7_v2 = vld [vmem:[#allocation1] sm:$0x1]  }
   0xa   :  { %12 = vrot.lane.b32.xlu0 %v11_v1, %s25_s0  ;;  %9 = vst.msk [vmem:[#allocation0] sm:$0x1] %vm8_vm0, %v7_v2  }
  0x7c   :  { %v13_v3 = vpop.permute.xlu0 %12  }
  0x7d   :  { %15 = vst.msk [vmem:[#allocation0] sm:$0x1] %vm14_vm1, %v13_v3  }
  0x84   :  { %v20_v4 = vld [vmem:[#allocation0] sm:$0x1] }
  0x85   :  { %23 = vst [vmem:[%s43_s1] sm:$0x1] %v20_v4 }

// kernel: graph_attn_bias.1
= control target key start
LH: loop header
LB: loop body
LE: loop exit
PB: predicated region body
PF: predicated region fallthrough
CT: control target
= control target key end

     0   :  { %v39_v0 = vlaneseq  ;;  %vm99_vm0 = vcmask 130048   ;;  %v723_v3 = vmov 0   ;;  %v724_v30 = vmov 1.0   ;;  %s929_s0 = inlined_call_operand.vmem [shape: f32[3,128], index: 0, kind: input, shape index: {}]   ;;  %s930_s1 = inlined_call_operand.vmem [shape: s32[12,128], index: 1, kind: input, shape index: {}]   ;;  %s931_s3 = inlined_call_operand.vmem [shape: f32[4,16,16], index: 3, kind: input, shape index: {}]   ;;  %s932_s2 = inlined_call_operand.vmem [shape: f32[16,16], index: 2, kind: input, shape index: {}]   ;;  %s933_s4 = inlined_call_operand.vmem [shape: f32[16,1], index: 4, kind: input, shape index: {}]   ;;  %s934_s5 = inlined_call_operand.vmem [shape: f32[16,128], index: 5, kind: output, shape index: {}]  }
   0x1   :  { %v758_v1 = vld [vmem:[%s929_s0] sm:$0x7]  ;;  %720 = vset.pattern.permute.xlu0 %v723_v3  ;;  %v34_v23 = vld [vmem:[%s933_s4 + $0x8] sm:$0xff] }
   0x2   :  { %v22_v2 = vld [vmem:[%s931_s3] sm:$0xff]  ;;  %v716_v4 = vtrunc.f32 %v758_v1  ;;  %v765_v5 = vshrl.u32 %v39_v0, 7  ;;  %v21_v37 = vld [vmem:[%s932_s2 + $0x8] sm:$0xff] }
   0x3   :  { %685 = vmatprep.mubr.msk.f32.mxu0 %vm99_vm0, %v22_v2  ;;  %v20_v6 = vld [vmem:[%s932_s2] sm:$0xff]  ;;  %v38_v38 = vld [vmem:[%s930_s1 + $0x8] sm:$0xf] }
   0x4   :  { %v774_v7 = vld [vmem:[%s930_s1] sm:$0xff]  ;;  %692 = vmatprep.mubr.msk.f32.mxu1 %vm99_vm0, %v20_v6  ;;  %v717_v8 = vcvt.f32.s32 %v716_v4  ;;  %v778_v9 = vadd.s32 8, %v765_v5  ;;  %v781_v10 = vsub.s32 1, %v765_v5  ;;  %v784_v11 = vsub.s32 0, %v765_v5 }
   0x5   :  { %v787_v12 = vsub.s32 2, %v765_v5  ;;  %v264_v13 = vsub.s32 3, %v765_v5  ;;  %v272_v14 = vsub.s32 4, %v765_v5  ;;  %v33_v15 = vld [vmem:[%s933_s4] sm:$0xff]  ;;  %v282_v35 = vsub.s32 5, %v765_v5 }
   0x6   :  { %vm52_vm1 = vcmp.eq.s32.totalorder %v717_v8, 0  ;;  %v66_v16 = vrot.slane %v774_v7, %v784_v11  ;;  %v74_v17 = vrot.slane %v774_v7, %v781_v10  ;;  %v45_v18 = vrot.slane %v717_v8, %v781_v10  ;;  %614 = vperm.xlu0 %720, %v33_v15   ;;  %v642_v41 = vld [vmem:[%s931_s3 + $0x20] sm:$0xff] }
   0x7   :  { %v53_v19 = vsel %vm52_vm1, 1, %v717_v8  ;;  %v84_v20 = vrot.slane %v774_v7, %v787_v12  ;;  %v804_v21 = vrot.slane %v774_v7, %v264_v13  ;;  %v807_v22 = vrot.slane %v774_v7, %v272_v14 }
   0x8   :  { %vm54_vm2 = vcmp.gt.s32.totalorder %v53_v19, 1  ;;  %v648_v24 = vadd.s32 4294967295, %v53_v19  ;;  %vm68_vm3 = vcmp.eq.s32.totalorder %v778_v9, %v66_v16  ;;  %vm76_vm4 = vcmp.eq.s32.totalorder %v778_v9, %v74_v17 }
   0x9   :  { %v70_v25 = vsel %vm68_vm3, 1, %v723_v3  ;;  %v78_v26 = vsel %vm76_vm4, 1, %v723_v3  ;;  %vm86_vm5 = vcmp.eq.s32.totalorder %v778_v9, %v84_v20  ;;  %vm47_vm6 = vcmp.eq.s32.totalorder %v778_v9, %v45_v18 }
   0xa   :  { %v56_v27 = vsel %vm54_vm2, %v648_v24, %v53_v19  ;;  %v80_v28 = vadd.s32 %v78_v26, %v70_v25  ;;  %v88_v29 = vsel %vm86_vm5, 1, %v723_v3  ;;  %688 = vmatprep.subr.msk.mxu1 %vm47_vm6, %v724_v30  ;;  %vm67_vm7 = vcmp.eq.s32.totalorder %v765_v5, %v66_v16  ;;  %619 = vperm.xlu0 %720, %v34_v23  }
   0xb   :  { %vm57_vm8 = vcmp.gt.s32.totalorder %v56_v27, 0  ;;  %689 = vmatpush3.msk.msra.mxu1 %vm47_vm6, %v724_v30  ;;  %v69_v31 = vsel %vm67_vm7, 1, %v723_v3  ;;  %vm75_vm9 = vcmp.eq.s32.totalorder %v765_v5, %v74_v17  ;;  %vm85_vm10 = vcmp.eq.s32.totalorder %v765_v5, %v84_v20 }
   0xc   :  { %v58_v32 = vsel %vm57_vm8, %v56_v27, 0  ;;  %v77_v33 = vsel %vm75_vm9, 1, %v723_v3  ;;  %v87_v34 = vsel %vm85_vm10, 1, %v723_v3  ;;  %vm46_vm12 = vcmp.eq.s32.totalorder %v765_v5, %v45_v18 }
   0xd   :  { %vm59_vm11 = vcmp.lt.s32.totalorder %v58_v32, 4  ;;  %v79_v36 = vadd.s32 %v77_v33, %v69_v31  ;;  %vm267_vm13 = vcmp.eq.s32.totalorder %v778_v9, %v804_v21  ;;  %v835_v40 = vadd.s32 %v88_v29, %v80_v28  ;;  %690 = vmatprep.subr.msk.mxu1 %vm46_vm12, %v724_v30 }
   0xe   :  { %v60_v39 = vsel %vm59_vm11, %v58_v32, 4  ;;  %vm275_vm14 = vcmp.eq.s32.totalorder %v778_v9, %v807_v22  ;;  %691 = vmatpush3.msk.msra.mxu1 %vm46_vm12, %v724_v30  ;;  %v269_v44 = vsel %vm267_vm13, 1, %v723_v3  ;;  %v283_v46 = vrot.slane %v774_v7, %v282_v35 }
   0xf   :  { %v61_v42 = vcvt.s32.f32 %v60_v39  ;;  %v842_v43 = vadd.s32 %v87_v34, %v79_v36  ;;  %v277_v45 = vsel %vm275_vm14, 1, %v723_v3  ;;  %693 = vmatmul.mubr.msk.f32.vlgmr.msra.gmra.mxu1 %vm99_vm0, %v21_v37  ;;  %v379_v47 = vsub.s32 6, %v765_v5 }
  0x10   :  { %v387_v48 = vsub.s32 7, %v765_v5  ;;  %v398_v49 = vrot.slane %v38_v38, %v784_v11  ;;  %706 = vmatprep.mubr.msk.f32.mxu1 %vm99_vm0, %v642_v41  ;;  %vm266_vm1 = vcmp.eq.s32.totalorder %v765_v5, %v804_v21  ;;  %v92_v52 = vcvt.s32.f32 %v835_v40  ;;  %v643_v40 = vld [vmem:[%s931_s3 + $0x28] sm:$0xff] }
  0x11   :  { %721 = vrcp.f32 %v61_v42  ;;  %v380_v50 = vrot.slane %v774_v7, %v379_v47  ;;  %v91_v53 = vcvt.s32.f32 %v842_v43  ;;  %v279_v54 = vadd.s32 %v277_v45, %v269_v44  ;;  %v641_v42 = vld [vmem:[%s931_s3 + $0x18] sm:$0xff]  ;;  %v644_v44 = vld [vmem:[%s931_s3 + $0x30] sm:$0xff] }
  0x12   :  { %v388_v51 = vrot.slane %v774_v7, %v387_v48  ;;  %vm400_vm15 = vcmp.eq.s32.totalorder %v778_v9, %v398_v49  ;;  %vm274_vm2 = vcmp.eq.s32.totalorder %v765_v5, %v807_v22  ;;  %vm285_vm3 = vcmp.eq.s32.totalorder %v778_v9, %v283_v46  ;;  %v645_v45 = vld [vmem:[%s931_s3 + $0x38] sm:$0xff] }
  0x13   :  { %vm382_vm4 = vcmp.eq.s32.totalorder %v778_v9, %v380_v50  ;;  %v402_v55 = vsel %vm400_vm15, 1, %v723_v3  ;;  %v268_v58 = vsel %vm266_vm1, 1, %v723_v3  ;;  %v276_v59 = vsel %vm274_vm2, 1, %v723_v3 }
  0x14   :  { %vm390_vm5 = vcmp.eq.s32.totalorder %v778_v9, %v388_v51  ;;  %v384_v56 = vsel %vm382_vm4, 1, %v723_v3  ;;  %vm284_vm6 = vcmp.eq.s32.totalorder %v765_v5, %v283_v46  ;;  %vm381_vm7 = vcmp.eq.s32.totalorder %v765_v5, %v380_v50 }
  0x15   :  { %v392_v57 = vsel %vm390_vm5, 1, %v723_v3  ;;  %vm389_vm8 = vcmp.eq.s32.totalorder %v765_v5, %v388_v51  ;;  %v287_v61 = vsel %vm285_vm3, 1, %v723_v3  ;;  %v383_v62 = vsel %vm381_vm7, 1, %v723_v3 }
  0x16   :  { %v394_v60 = vadd.s32 %v392_v57, %v384_v56  ;;  %v391_v63 = vsel %vm389_vm8, 1, %v723_v3  ;;  %vm399_vm9 = vcmp.eq.s32.totalorder %v765_v5, %v398_v49  ;;  %v278_v0 = vadd.s32 %v276_v59, %v268_v58 }
  0x17   :  { %v393_v2 = vadd.s32 %v391_v63, %v383_v62  ;;  %v401_v4 = vsel %vm399_vm9, 1, %v723_v3  ;;  %v495_v6 = vrot.slane %v38_v38, %v781_v10  ;;  %v286_v8 = vsel %vm284_vm6, 1, %v723_v3 }
  0x18   :  { %v404_v7 = vadd.s32 %v402_v55, %v394_v60  ;;  %v503_v14 = vrot.slane %v38_v38, %v787_v12  ;;  %v513_v15 = vrot.slane %v38_v38, %v264_v13  ;;  %v289_v16 = vadd.s32 %v287_v61, %v279_v54 }
  0x19   :  { %v403_v17 = vadd.s32 %v401_v4, %v393_v2  ;;  %vm497_vm10 = vcmp.eq.s32.totalorder %v778_v9, %v495_v6  ;;  %vm496_vm11 = vcmp.eq.s32.totalorder %v765_v5, %v495_v6  ;;  %v288_v20 = vadd.s32 %v286_v8, %v278_v0 }
  0x1a   :  { %v499_v18 = vsel %vm497_vm10, 1, %v723_v3  ;;  %vm505_vm12 = vcmp.eq.s32.totalorder %v778_v9, %v503_v14  ;;  %vm515_vm13 = vcmp.eq.s32.totalorder %v778_v9, %v513_v15  ;;  %v498_v19 = vsel %vm496_vm11, 1, %v723_v3 }
  0x1b   :  { %v507_v21 = vsel %vm505_vm12, 1, %v723_v3  ;;  %v517_v22 = vsel %vm515_vm13, 1, %v723_v3  ;;  %vm504_vm14 = vcmp.eq.s32.totalorder %v765_v5, %v503_v14  ;;  %v406_v13 = vcvt.s32.f32 %v404_v7 }
  0x1c   :  { %v509_v23 = vadd.s32 %v507_v21, %v499_v18  ;;  %v506_v24 = vsel %vm504_vm14, 1, %v723_v3  ;;  %vm514_vm15 = vcmp.eq.s32.totalorder %v765_v5, %v513_v15  ;;  %v405_v26 = vcvt.s32.f32 %v403_v17  ;;  %v23_v5 = vld [vmem:[%s931_s3 + $0x8] sm:$0xff] }
  0x1d   :  { %v508_v27 = vadd.s32 %v506_v24, %v498_v19  ;;  %v516_v9 = vsel %vm514_vm15, 1, %v723_v3  ;;  %v291_v29 = vcvt.s32.f32 %v289_v16  ;;  %v290_v31 = vcvt.s32.f32 %v288_v20 }
  0x1e   :  { %v722_v25 = vpop.eup %721  ;;  %v519_v30 = vadd.s32 %v517_v22, %v509_v23  ;;  %v607_v56 = vmul.f32 2.0, %v758_v1  ;;  %v629_v2 = vrot.slane %v758_v1, %v787_v12 }
  0x1f   :  { %v96_v28 = vrot.slane %v722_v25, %v781_v10  ;;  %v518_v35 = vadd.s32 %v516_v9, %v508_v27  ;;  %v640_v10 = vld [vmem:[%s931_s3 + $0x10] sm:$0xff] }
  0x20   :  { %v521_v38 = vcvt.s32.f32 %v519_v30  ;;  %v611_v62 = vrot.slane %v607_v56, %v784_v11 }
  0x21   :  { %v98_v32 = vmul.f32 %v96_v28, %v92_v52  ;;  %v97_v33 = vmul.f32 %v96_v28, %v91_v53  ;;  %v408_v34 = vmul.f32 %v406_v13, %v96_v28  ;;  %v407_v36 = vmul.f32 %v405_v26, %v96_v28 }
  0x22   :  { %v293_v37 = vmul.f32 %v291_v29, %v96_v28  ;;  %v292_v3 = vmul.f32 %v290_v31, %v96_v28  ;;  %v520_v39 = vcvt.s32.f32 %v518_v35  ;;  %v523_v41 = vmul.f32 %v521_v38, %v96_v28 }
  0x23   :  { %681 = vmatprep.subr.mxu0 %v98_v32  ;;  %702 = vmatprep.subr.mxu1 %v408_v34 }
  0x24   :  { %682 = vmatpush3.msra.mxu0 %v98_v32  ;;  %703 = vmatpush3.msra.mxu1 %v408_v34  ;;  %v522_v43 = vmul.f32 %v520_v39, %v96_v28 }
  0x25   :  { %683 = vmatprep.subr.mxu0 %v97_v33  ;;  %704 = vmatprep.subr.mxu1 %v407_v36 }
  0x26   :  { %684 = vmatpush3.msra.mxu0 %v97_v33  ;;  %705 = vmatpush3.msra.mxu1 %v407_v36 }
  0x27   :  { %686 = vmatmul.mubr.msk.f32.vlgmr.msra.gmra.mxu0 %vm99_vm0, %v23_v5  ;;  %695 = vmatprep.subr.mxu0 %v293_v37 }
  0x28   :  { %696 = vmatpush3.msra.mxu0 %v293_v37  ;;  %699 = vmatprep.mubr.msk.f32.mxu0 %vm99_vm0, %v640_v10 }
  0x29   :  { %697 = vmatprep.subr.mxu0 %v292_v3  ;;  %707 = vmatmul.mubr.msk.f32.vlgmr.msra.gmra.mxu1 %vm99_vm0, %v643_v40 }
  0x2a   :  { %698 = vmatpush3.msra.mxu0 %v292_v3 }
  0x2b   :  { %700 = vmatmul.mubr.msk.f32.vlgmr.msra.gmra.mxu0 %vm99_vm0, %v641_v42  ;;  %709 = vmatprep.subr.mxu0 %v523_v41 }
  0x2c   :  { %710 = vmatpush3.msra.mxu0 %v523_v41  ;;  %713 = vmatprep.mubr.msk.f32.mxu0 %vm99_vm0, %v644_v44 }
  0x2d   :  { %711 = vmatprep.subr.mxu0 %v522_v43 }
  0x2e   :  { %712 = vmatpush3.msra.mxu0 %v522_v43 }
  0x2f   :  { %714 = vmatmul.mubr.msk.f32.vlgmr.msra.gmra.mxu0 %vm99_vm0, %v645_v45 }
  0x81   :  { %v615_v51 = vpop.permute.xlu0 %614 }
  0x82   :  { %v622_v17 = vadd.f32 %v615_v51, %v611_v62 }
  0x85   :  { %v620_v4 = vpop.permute.xlu0 %619 }
  0x86   :  { %v623_v14 = vadd.f32 %v620_v4, %v611_v62 }
  0xcf   :  { %v694_v46 = vpop.f32.mrf.mxu1 }
  0xd1   :  { %v253_v48 = vpop.f32.mrf.mxu1 }
  0xe7   :  { %v687_v47 = vpop.f32.mrf.mxu0 }
  0xe8   :  { %v259_v50 = vadd.f32 %v694_v46, %v687_v47 }
  0xe9   :  { %v172_v49 = vpop.f32.mrf.mxu0  ;;  %v708_v53 = vpop.f32.mrf.mxu1 }
  0xea   :  { %v254_v54 = vadd.f32 %v253_v48, %v172_v49 }
  0xeb   :  { %v701_v52 = vpop.f32.mrf.mxu0  ;;  %v481_v60 = vpop.f32.mrf.mxu1 }
  0xec   :  { %v376_v55 = vadd.f32 %v701_v52, %v259_v50 }
  0xed   :  { %v366_v57 = vpop.f32.mrf.mxu0 }
  0xee   :  { %v491_v58 = vadd.f32 %v708_v53, %v376_v55  ;;  %v375_v59 = vadd.f32 %v366_v57, %v254_v54 }
  0xef   :  { %v715_v61 = vpop.f32.mrf.mxu0 }
  0xf0   :  { %v490_v63 = vadd.f32 %v481_v60, %v375_v59  ;;  %v606_v0 = vadd.f32 %v715_v61, %v491_v58 }
  0xf1   :  { %v596_v6 = vpop.f32.mrf.mxu0 }
  0xf2   :  { %v625_v7 = vsub.f32 %v606_v0, %v620_v4  ;;  %v605_v8 = vadd.f32 %v596_v6, %v490_v63 }
  0xf4   :  { %v631_v15 = vmul.f32 %v629_v2, %v625_v7  ;;  %v624_v16 = vsub.f32 %v605_v8, %v615_v51 }
  0xf6   :  { %v633_v18 = vadd.f32 %v631_v15, %v623_v14  ;;  %v630_v19 = vmul.f32 %v629_v2, %v624_v16 }
  0xf8   :  { %635 = vst [vmem:[%s934_s5 + $0x8] sm:$0xff] %v633_v18  ;;  %v632_v11 = vadd.f32 %v630_v19, %v622_v17 }
  0xfa   :  { %634 = vst [vmem:[%s934_s5] sm:$0xff] %v632_v11 }

</bundles_post_ra>
